<compile_context>
chip_gen: v7x
topology: tpu7x:2x2x1
jax: 0.10.0
libtpu: 0.0.40
codegen_flags: <defaults>
</compile_context>

<pallas_src>
import functools
import math

import jax
import jax.numpy as jnp
from jax.experimental import pallas as pl
from jax.experimental.pallas import tpu as pltpu


def _pixel_shuffle_kernel(sel_ref, x_ref, o_ref, *, r, cc, compute_dtype):
    # sel_ref: (r, cc, cc*r)   0/1 selection matrices: sel[k, p, q] = (q == p*r + k)
    # x_ref  : (1, r, tm, tl)  the r channel-groups feeding this output tile
    # o_ref  : (1, tm, tl*r)   lane-interleaved output tile
    tl = x_ref.shape[-1]
    for j in range(tl // cc):                    # static -> fully unrolled
        lo, hi = j * cc, (j + 1) * cc
        acc = jnp.dot(x_ref[0, 0, :, lo:hi].astype(compute_dtype), sel_ref[0],
                      preferred_element_type=jnp.float32)
        for k in range(1, r):                    # r is a small static constant
            acc += jnp.dot(x_ref[0, k, :, lo:hi].astype(compute_dtype), sel_ref[k],
                           preferred_element_type=jnp.float32)
        o_ref[0, :, lo * r:hi * r] = acc.astype(o_ref.dtype)


def _largest_divisor(n, multiple, cap):
    """Largest d <= cap with n % d == 0 and d % multiple == 0, else None."""
    for d in range(min(cap, n), multiple - 1, -1):
        if n % d == 0 and d % multiple == 0:
            return d
    return None


def pixel_shuffle_1d(x, upscale_factor=2):
    b, c_in, h, w = x.shape
    r = int(upscale_factor)
    assert c_in % r == 0, "channel dim must be divisible by upscale factor"
    cl = c_in // r
    if r == 1:
        return x

    x_dtype = x.dtype
    itemsize = x.dtype.itemsize
    # MXU-friendly compute dtype.  The selection matmul is exact for floats
    # (each output element receives exactly one 1.0-weighted term).
    if x_dtype in (jnp.bfloat16, jnp.float32):
        compute_dtype = x_dtype
    else:
        # TODO(synk): integer inputs with |x| > 2^24 lose precision on the f32
        # matmul path; an exact copy/pack path would be needed for those.
        compute_dtype = jnp.float32
    comp_size = 2 if compute_dtype == jnp.bfloat16 else 4

    LANE = 128
    sub_g = {4: 8, 2: 16, 1: 32}.get(itemsize, 8)   # sublane granule of x dtype

    # ---- layout: split H = h1*h2, sublanes = Cl*h1, lanes = h2*W -------------
    h_divs = [d for d in range(1, h + 1) if h % d == 0]
    lane_ext = lambda d: (h // d) * w
    # prefer output lane extents that are multiples of 128 (unmasked stores)
    cands = [d for d in h_divs if (lane_ext(d) * r) % LANE == 0] or h_divs
    # fill the sublanes (fixes the Cl < 8 underfill) without shrinking lanes more
    # than necessary
    filled = [d for d in cands if cl * d >= sub_g]
    h1 = min(filled) if filled else max(cands)
    m, lf = cl * h1, lane_ext(h1)

    # ---- tile sizes (double-buffered in+out ~= 4*r*tm*tl*itemsize bytes) -----
    VMEM_BUDGET = 20 * 1024 * 1024            # fits 32 MiB scoped limit everywhere
    tm = m if m <= 512 else (_largest_divisor(m, sub_g, 512) or m)
    tl_cap = min(max(LANE, VMEM_BUDGET // (4 * r * tm * itemsize)), 4096)
    if lf <= tl_cap:
        tl = lf
    else:
        tl = _largest_divisor(lf, LANE, tl_cap) or lf   # full extent as last resort

    # v7x has two TensorCores: make sure a parallel grid axis is splittable at B==1.
    if b == 1 and m // tm == 1 and lf // tl == 1:
        if tm % (2 * sub_g) == 0:
            tm //= 2
        elif tl % (2 * LANE) == 0:
            tl //= 2

    # ---- contraction chunk (decoupled from the lane tile) --------------------
    lane_align = LANE // math.gcd(r, LANE)    # keeps cc*r a multiple of 128
    c_target = max(128 if comp_size <= 2 else 64, lane_align)
    if tl % c_target == 0:
        cc = c_target
    else:
        cc = _largest_divisor(tl, 1, c_target) or tl
        if tl // cc > 64 and r * r * tl * tl * comp_size <= (8 << 20):
            cc = tl                           # avoid pathological unroll counts

    # ---- 0/1 selection tensor: sel[k, p, q] = (q == p*r + k) -----------------
    p_idx = jnp.arange(cc, dtype=jnp.int32)
    q_idx = jnp.arange(cc * r, dtype=jnp.int32)
    k_idx = jnp.arange(r, dtype=jnp.int32)
    sel = (q_idx[None, None, :]
           == p_idx[None, :, None] * r + k_idx[:, None, None]).astype(compute_dtype)
    sel_bytes = sel.size * comp_size

    # Pure row-major view (no data movement), mirrors torch's first .view().
    x2 = x.reshape(b, r, m, lf)

    grid = (b, m // tm, lf // tl)
    est_vmem = 4 * r * tm * tl * itemsize + 2 * sel_bytes + (1 << 20)
    vmem_limit = int(min(max(32 << 20, est_vmem * 5 // 4), 64 << 20))

    cost = pl.CostEstimate(
        flops=2 * r * r * cc * b * m * lf,
        transcendentals=0,
        bytes_accessed=2 * b * c_in * h * w * itemsize + sel_bytes,
    )

    out2 = pl.pallas_call(
        functools.partial(_pixel_shuffle_kernel, r=r, cc=cc,
                          compute_dtype=compute_dtype),
        out_shape=jax.ShapeDtypeStruct((b, m, lf * r), x_dtype),
        grid=grid,
        in_specs=[
            # Constant index_map -> sel is fetched once and stays VMEM-resident.
            pl.BlockSpec((r, cc, cc * r), lambda bi, mi, li: (0, 0, 0)),
            pl.BlockSpec((1, r, tm, tl), lambda bi, mi, li: (bi, 0, mi, li)),
        ],
        out_specs=pl.BlockSpec((1, tm, tl * r), lambda bi, mi, li: (bi, mi, li)),
        compiler_params=pltpu.CompilerParams(
            dimension_semantics=("parallel", "parallel", "parallel"),
            vmem_limit_bytes=vmem_limit,
        ),
        cost_estimate=cost,
    )(sel, x2)

    # Pure row-major view, mirrors torch's final .view().
    return out2.reshape(b, cl, h, w * r)


def _reference(x, r):
    # Pure-JAX reference replicating the PyTorch forward exactly.
    b, c, h, w = x.shape
    cl = c // r
    y = x.reshape(b, r, cl, h, w)
    y = jnp.transpose(y, (0, 2, 3, 4, 1))
    return y.reshape(b, cl, h, w * r)


if __name__ == "__main__":
    # PixelShuffle1D has no learnable parameters, so nothing to initialize.
    key = jax.random.PRNGKey(0)

    # Case 1: the module's demo shape (float32).
    B, C, H, W = 2, 4, 16, 16
    x = jax.random.normal(key, (B, C, H, W), dtype=jnp.float32)
    out = jax.block_until_ready(pixel_shuffle_1d(x, upscale_factor=2))
    assert out.shape == (B, C // 2, H, W * 2), out.shape
    assert jnp.allclose(out, _reference(x, 2)), "f32 kernel does not match reference"

    # Case 2: bf16, B=1 (exercises the chunked contraction + megacore split).
    k2 = jax.random.PRNGKey(1)
    x2 = jax.random.normal(k2, (1, 32, 8, 64), dtype=jnp.bfloat16)
    out2 = jax.block_until_ready(pixel_shuffle_1d(x2, upscale_factor=2))
    assert out2.shape == (1, 16, 8, 128), out2.shape
    assert jnp.allclose(out2, _reference(x2, 2)), "bf16 kernel does not match reference"

    print("KERNEL_OK")
</pallas_src>

<mosaic_0001>
module attributes {stable_mosaic.version = 11 : i64} {
  func.func @_pixel_shuffle_kernel(%arg0: i32, %arg1: i32, %arg2: i32, %arg3: memref<2x64x128xf32, #tpu.memory_space<vmem>>, %arg4: memref<1x2x8x64xf32, #tpu.memory_space<vmem>>, %arg5: memref<1x8x128xf32, #tpu.memory_space<vmem>>) attributes {dimension_semantics = [#tpu.dimension_semantics<parallel>, #tpu.dimension_semantics<parallel>, #tpu.dimension_semantics<parallel>], iteration_bounds = array<i64: 2, 1, 1>, scalar_prefetch = 0 : i64, scratch_operands = 0 : i64, tpu.core_type = #tpu.core_type<tc>, window_params = [{pipeline_mode = #tpu.pipeline_mode<synchronous>, transform_indices = @transform_0, window_bounds = array<i64: 2, 64, 128>}, {transform_indices = @transform_1, window_bounds = array<i64: 1, 2, 8, 64>}, {transform_indices = @transform_2, window_bounds = array<i64: 1, 8, 128>}]} {
    %c0 = arith.constant 0 : index
    %c0_0 = arith.constant 0 : index
    %c0_1 = arith.constant 0 : index
    %c0_2 = arith.constant 0 : index
    %0 = vector.load %arg4[%c0, %c0_0, %c0_1, %c0_2] : memref<1x2x8x64xf32, #tpu.memory_space<vmem>>, vector<1x1x8x64xf32>
    %1 = vector.shape_cast %0 : vector<1x1x8x64xf32> to vector<8x64xf32>
    %c0_3 = arith.constant 0 : index
    %c0_4 = arith.constant 0 : index
    %c0_5 = arith.constant 0 : index
    %2 = vector.load %arg3[%c0_3, %c0_4, %c0_5] : memref<2x64x128xf32, #tpu.memory_space<vmem>>, vector<1x64x128xf32>
    %3 = vector.shape_cast %2 : vector<1x64x128xf32> to vector<64x128xf32>
    %cst = arith.constant dense<0.000000e+00> : vector<8x128xf32>
    %4 = tpu.matmul %1, %3, %cst {dimension_numbers = #tpu.dot_dimension_numbers<[1], [0], [0], [1], [0, 0, 1, 1], [], []>} : vector<8x64xf32>, vector<64x128xf32>, vector<8x128xf32> -> vector<8x128xf32>
    %c0_6 = arith.constant 0 : index
    %c1 = arith.constant 1 : index
    %c0_7 = arith.constant 0 : index
    %c0_8 = arith.constant 0 : index
    %5 = vector.load %arg4[%c0_6, %c1, %c0_7, %c0_8] : memref<1x2x8x64xf32, #tpu.memory_space<vmem>>, vector<1x1x8x64xf32>
    %6 = vector.shape_cast %5 : vector<1x1x8x64xf32> to vector<8x64xf32>
    %c1_9 = arith.constant 1 : index
    %c0_10 = arith.constant 0 : index
    %c0_11 = arith.constant 0 : index
    %7 = vector.load %arg3[%c1_9, %c0_10, %c0_11] : memref<2x64x128xf32, #tpu.memory_space<vmem>>, vector<1x64x128xf32>
    %8 = vector.shape_cast %7 : vector<1x64x128xf32> to vector<64x128xf32>
    %cst_12 = arith.constant dense<0.000000e+00> : vector<8x128xf32>
    %9 = tpu.matmul %6, %8, %cst_12 {dimension_numbers = #tpu.dot_dimension_numbers<[1], [0], [0], [1], [0, 0, 1, 1], [], []>} : vector<8x64xf32>, vector<64x128xf32>, vector<8x128xf32> -> vector<8x128xf32>
    %10 = arith.addf %4, %9 : vector<8x128xf32>
    %c0_13 = arith.constant 0 : index
    %c0_14 = arith.constant 0 : index
    %c0_15 = arith.constant 0 : index
    %11 = vector.load %arg5[%c0_13, %c0_14, %c0_15] : memref<1x8x128xf32, #tpu.memory_space<vmem>>, vector<1x8x128xf32>
    %12 = vector.shape_cast %11 : vector<1x8x128xf32> to vector<8x128xf32>
    %13 = vector.shape_cast %10 : vector<8x128xf32> to vector<1x8x128xf32>
    tpu.vector_store %arg5[%c0_13, %c0_14, %c0_15], %13 {strides = array<i32>} : memref<1x8x128xf32, #tpu.memory_space<vmem>>, vector<1x8x128xf32>,
    return
  }
  func.func @transform_0(%arg0: i32, %arg1: i32, %arg2: i32) -> (i32, i32, i32) {
    %c0_i32 = arith.constant 0 : i32
    %c0_i32_0 = arith.constant 0 : i32
    %c0_i32_1 = arith.constant 0 : i32
    %c0_i32_2 = arith.constant 0 : i32
    return %c0_i32, %c0_i32_0, %c0_i32_1 : i32, i32, i32
  }
  func.func @transform_1(%arg0: i32, %arg1: i32, %arg2: i32) -> (i32, i32, i32, i32) {
    %c0_i32 = arith.constant 0 : i32
    %c0_i32_0 = arith.constant 0 : i32
    return %arg0, %c0_i32, %arg1, %arg2 : i32, i32, i32, i32
  }
  func.func @transform_2(%arg0: i32, %arg1: i32, %arg2: i32) -> (i32, i32, i32) {
    %c0_i32 = arith.constant 0 : i32
    return %arg0, %arg1, %arg2 : i32, i32, i32
  }
}

</mosaic_0001>

<bundles_post_ra>
// kernel: tpu_custom_call.1
= control target key start
LH: loop header
LB: loop body
LE: loop exit
PB: predicated region body
PF: predicated region fallthrough
CT: control target
= control target key end

     0   :  { %7 = vsyncpa [#allocation3], 0  ;;  %s1064_s0 = inlined_call_operand.hbm [shape: f32[2,64,128], index: 0, kind: input, shape index: {}]   ;;  %s1065_s1 = inlined_call_operand.hbm [shape: f32[2,2,8,64], index: 1, kind: input, shape index: {}]   ;;  %s1066_s2 = inlined_call_operand.hbm [shape: f32[2,8,128], index: 2, kind: output, shape index: {}]  }
   0x1   :  { %8 = vsyncpa [#allocation6], 0 }
   0x2   :  { %10 = vsyncpa [#allocation6 + $0x1], 0 }
   0x3   :  { %11 = vsyncpa [#allocation4], 0 }
   0x4   :  { %13 = vsyncpa [#allocation4 + $0x1], 0  ;;  %s836_s9 = smov 0   ;;  %s838_s10 = smov 0  }
   0x5   :  { %s840_s11 = smov 0   ;;  %s842_s12 = smov 0  }
   0x6   :  { %s844_s13 = smov 0   ;;  %s846_s14 = smov 0  }
   0x7 LB: > { %s488_s15 = sadd.s32 4294967295, %s811_s14   ;;  %s489_s16 = sadd.s32 4294967294, %s811_s14   ;;  %s811_s14 = sphi %s846_s14, %s19_s14   ;;  %s807_s13 = sphi %s844_s13, %s1090_s13   ;;  %s803_s12 = sphi %s842_s12, %s1089_s12   ;;  %s799_s11 = sphi %s840_s11, %s1088_s11   ;;  %s795_s10 = sphi %s838_s10, %s1087_s10   ;;  %s791_s9 = sphi %s836_s9, %s1086_s9  }
   0x8   : > { %p83_p0 = scmp.ne.s32.totalorder %s795_s10, %s791_s9  ;;  %p870_p1 = scmp.eq.s32.totalorder %s488_s15, 0 }
   0x9   : > { %p874_p2 = scmp.eq.s32.totalorder %s488_s15, 1  ;;  %p117_p3 = scmp.eq.s32.totalorder %s489_s16, 1 }
   0xa   : > { %s1071_s17 = scalar_select %p870_p1, 1, 0 }
   0xb   : > { %s1072_s18 = scalar_select %p874_p2, 1, 0 }
   0xc   : > { %p880_p4 = por %p870_p1, %p83_p0  ;;  %p490_p5 = scmp.ge.s32.totalorder %s811_s14, 1 }
   0xd   : > { %p885_p6 = por %p117_p3, %p83_p0  ;;  %p124_p7 = scmp.lt.s32.totalorder %s811_s14, 3 }
   0xe   : > { %s1073_s19 = scalar_select %p880_p4, 1, 0 }
   0xf   : > { %s1074_s20 = scalar_select %p885_p6, 1, 0 }
  0x10   : > { %p890_p8 = pnand %p490_p5, %p124_p7  ;;  %s813_s22 = smov [#allocation2]  }
  0x11   : > { %s136_s23 = sshll.u32 %s813_s22, 4  ;;  %s38_s25 = sadd.s32 1, %s807_s13  ;;  %s137_s23 = int_to_ptr.vmem [resolvable:$true] %s136_s23 }
  0x12   : > { %s1075_s21 = scalar_select %p890_p8, 1, 0 }
  0x13   : > { %p597_p9 = pneg %p890_p8  ;;  %s667_s28 = scalar_lea.hbm %s1064_s0, 2048 }
  0x14   : > { %p668_p12 = scmp.ne.s32.totalorder %s1064_s0, %s667_s28  ;;  %p674_p5 = scmp.lt.u32.totalorder %s667_s28, %s1064_s0 }
  0x15   : > { %p899_p11 = pnand %p597_p9, %p870_p1 }
  0x17   : > { %p669_p13 = pneg %p899_p11 }
  0x19   : > { %p670_p0 = pnand %p669_p13, %p668_p12 }
  0x1b   : > { %p671_p3 = pneg %p670_p0 }
  0x1d   : > { %p676_p7 = pnand %p674_p5, %p671_p3 }
  0x1f   : > { %679 = shalt.err (!%p676_p7)
}
  0x20   : > { %s680_s5 = scalar_lea.vmem %s137_s23, 2048  ;;  %p688_p4 = scmp.lt.s32.totalorder %s137_s23, %s137_s23 }
  0x21   : > { %p681_p9 = scmp.ne.s32.totalorder %s137_s23, %s680_s5  ;;  %p689_p1 = scmp.lt.s32.totalorder %s680_s5, %s680_s5 }
  0x23   : > { %p683_p10 = pnand %p681_p9, %p669_p13  ;;  %p690_p8 = por %p689_p1, %p688_p4 }
  0x25   : > { %p684_p6 = pneg %p683_p10 }
  0x27   : > { %p691_p2 = pnand %p690_p8, %p684_p6 }
  0x29   : > { %694 = shalt.err (!%p691_p2)
}
  0x2a   : > { %s814_s6 = smov 128   ;;  %s815_s7 = smov 8  }
  0x2b   : > { %600 = dma.hbm_to_vmem [thread:$0]  (!%p899_p11), %s1064_s0, 2048, %s137_s23, [#allocation3], %s814_s6, %s814_s6, %s815_s7  }
  0x2c   : > { %p40_p1 = scmp.ge.s32.totalorder %s38_s25, 2  ;;  %s70_s16 = sadd.s32 1, %s799_s11 }
  0x2d   : > { %p77_p2 = scmp.ne.s32.totalorder %s799_s11, %s795_s10  ;;  %p78_p4 = scmp.eq.s32.totalorder %s811_s14, 0 }
  0x2e   : > { %s1092_s25 = smov (%p40_p1, %s38_s25), 0  ;;  %p1078_p8 = scmp.ne.s32.totalorder %s1072_s18, 0 }
  0x2f   : > { %p929_p6 = por %p78_p4, %p77_p2  ;;  %s63_s26 = ssub.s32 %s807_s13, %s1092_s25 }
  0x30   : > { %p935_p10 = por %p1078_p8, %p77_p2  ;;  %p610_p12 = scmp.lt.s32.totalorder %s811_s14, 2 }
  0x31   : > { %p68_p11 = scmp.eq.s32.totalorder %s63_s26, 0  ;;  %s150_s23 = sand.u32 1, %s799_s11  }
  0x32   : > { %s493_s27 = sshll.u32 %s150_s23, 4  ;;  %s507_s29 = sshll.u32 %s807_s13, 8 }
  0x33   : > { %s944_s28 = scalar_select %p68_p11, %s799_s11, %s70_s16  }
  0x34   : > { %s950_s4 = scalar_lea.hbm %s1065_s1, %s507_s29  ;;  %s154_s18 = scalar_lea.vmem [#allocation5], %s493_s27 }
  0x35   : > { %s163_s5 = sshll.u32 %s154_s18, 4  ;;  %p956_p13 = pnand %p610_p12, %p929_p6  ;;  %s952_s5 = int_to_ptr.vmem [resolvable:$true] %s163_s5 }
  0x36   : > { %s960_s15 = scalar_lea.sflag [#allocation6], %s150_s23  ;;  %s695_s16 = scalar_lea.hbm %s950_s4, 256 }
  0x37   : > { %p696_p0 = scmp.ne.s32.totalorder %s950_s4, %s695_s16  ;;  %p697_p3 = pneg %p956_p13 }
  0x38   : > { %s700_s22 = scalar_lea.hbm %s1065_s1, 512  ;;  %p701_p9 = scmp.lt.u32.totalorder %s950_s4, %s1065_s1 }
  0x39   : > { %p698_p5 = pnand %p697_p3, %p696_p0  ;;  %p702_p1 = scmp.lt.u32.totalorder %s700_s22, %s695_s16 }
  0x3a   : > { %p704_p4 = scmp.lt.u32.totalorder %s695_s16, %s950_s4 }
  0x3b   : > { %p699_p7 = pneg %p698_p5  ;;  %p703_p2 = por %p702_p1, %p701_p9 }
  0x3d   : > { %p705_p6 = por %p704_p4, %p703_p2 }
  0x3f   : > { %p706_p8 = pnand %p705_p6, %p699_p7 }
  0x41   : > { %709 = shalt.err (!%p706_p8)
}
  0x42   : > { %s710_s23 = scalar_lea.vmem %s952_s5, 256  ;;  %s816_s3 = smov [#allocation5]  }
  0x43   : > { %p711_p12 = scmp.ne.s32.totalorder %s952_s5, %s710_s23  ;;  %s715_s18 = sshll.u32 %s816_s3, 4  ;;  %s716_s18 = int_to_ptr.vmem [resolvable:$false] %s715_s18 }
  0x44   : > { %s717_s26 = scalar_lea.vmem %s716_s18, 512  ;;  %p718_p5 = scmp.lt.s32.totalorder %s952_s5, %s716_s18 }
  0x45   : > { %p713_p11 = pnand %p711_p12, %p697_p3  ;;  %p719_p9 = scmp.lt.s32.totalorder %s717_s26, %s710_s23 }
  0x47   : > { %p714_p0 = pneg %p713_p11  ;;  %p720_p1 = por %p719_p9, %p718_p5 }
  0x49   : > { %p721_p2 = pnand %p720_p1, %p714_p0 }
  0x4b   : > { %724 = shalt.err (!%p721_p2)
}
  0x4c   : > { %604 = dma.hbm_to_vmem [thread:$0]  (!%p956_p13), %s950_s4, 256, %s952_s5, %s960_s15, %s814_s6, %s814_s6, %s815_s7  }
  0x4d   : > { %p1081_p3 = scmp.ne.s32.totalorder %s1075_s21, 0 }
  0x4e   : > { %p1082_p7 = scmp.ne.s32.totalorder (!%p1081_p3), %s1071_s17, 0 }
  0x4f   : > { %175 = sbr.rel (%p1081_p3) target bundleno = 338 (0x152), region = 28 }
  0x56   : > { %778 = dma.done.wait (%p1082_p7), [#allocation3], 2048  }
  0x57   : > { %780 = vsyncadd (%p1082_p7), [#allocation3], 4294965248  ;;  %s998_s16 = sand.u32 1, %s795_s10   ;;  %p1083_p13 = scmp.ne.s32.totalorder %s1073_s19, 0 }
  0x58   : > { %s498_s8 = sshll.u32 %s998_s16, 4  ;;  %s182_s27 = scalar_lea.sflag [#allocation6], %s998_s16 }
  0x59   : > { %s1002_s22 = scalar_lea.vmem [#allocation5], %s498_s8 }
  0x5a   : > { %782 = dma.done.wait (%p1083_p13), %s182_s27, 256  }
  0x5b   : > { %784 = vsyncadd (%p1083_p13), %s182_s27, 4294967040  ;;  %v817_v0 = vmov 0.0|0.0   ;;  %vm818_vm0 = vmmov 0   ;;  %v819_v1 = vmov 0.0   ;;  %v218_v2 = vld [vmem:[#allocation2 + $0x40] sm:$0xff]  ;;  %v219_v3 = vld [vmem:[#allocation2 + $0x48] sm:$0xff] }
  0x5c   : > { %564 = vmatprep.subr.bf16.mxu1 %v817_v0  ;;  %576 = vmatprep.subr.bf16.mxu0 %v817_v0  ;;  %v207_v4 = vld [vmem:[#allocation2] sm:$0xff]  ;;  %v565_v5 = vpack.c.bf16 %v219_v3, %v218_v2  ;;  %v208_v6 = vld [vmem:[#allocation2 + $0x8] sm:$0xff]  ;;  %v220_v7 = vld [vmem:[#allocation2 + $0x50] sm:$0xff]  ;;  %vm226_vm1 = vcmask 523264   ;;  %s499_s17 = sshll.u32 %s998_s16, 3  ;;  %s504_s19 = sshll.u32 %s803_s12, 7 }
  0x5d   : > { %542 = vmatprep.mubr.msk.f32.mxu1 %vm818_vm0, %v819_v1  ;;  %561 = vmatprep.mubr.msk.f32.mxu0 %vm818_vm0, %v819_v1  ;;  %v221_v8 = vld [vmem:[#allocation2 + $0x58] sm:$0xff]  ;;  %v577_v9 = vpack.c.bf16 %v208_v6, %v207_v4  ;;  %v209_v10 = vld [vmem:[#allocation2 + $0x10] sm:$0xff]  ;;  %v222_v14 = vld [vmem:[#allocation2 + $0x60] sm:$0xff]  ;;  %s205_s21 = scalar_lea.vmem [#allocation7], %s499_s17  ;;  %s1015_s5 = scalar_lea.hbm %s1066_s2, %s504_s19 }
  0x5e   : > { %v210_v11 = vld [vmem:[#allocation2 + $0x18] sm:$0xff]  ;;  %566 = vmatpush3.bf16.msra.mxu1 %v565_v5  ;;  %v568_v12 = vpack.c.bf16 %v221_v8, %v220_v7  ;;  %v223_v15 = vld [vmem:[#allocation2 + $0x68] sm:$0xff]  ;;  %v211_v16 = vld [vmem:[#allocation2 + $0x20] sm:$0xff]  ;;  %s390_s6 = sshll.u32 %s205_s21, 4  ;;  %s375_s15 = scalar_lea.sflag [#allocation4], %s998_s16  ;;  %s1017_s6 = int_to_ptr.vmem [resolvable:$true] %s390_s6 }
  0x5f   : > { %578 = vmatpush3.bf16.msra.mxu0 %v577_v9  ;;  %567 = vmatprep.subr.bf16.mxu1 %v817_v0  ;;  %v580_v13 = vpack.c.bf16 %v210_v11, %v209_v10  ;;  %v212_v17 = vld [vmem:[#allocation2 + $0x28] sm:$0xff]  ;;  %v571_v18 = vpack.c.bf16 %v223_v15, %v222_v14  ;;  %v224_v20 = vld [vmem:[#allocation2 + $0x70] sm:$0xff]  ;;  %v225_v21 = vld [vmem:[#allocation2 + $0x78] sm:$0xff]  ;;  %s725_s12 = scalar_lea.vmem %s1017_s6, 128  ;;  %s820_s29 = smov [#allocation7]  }
  0x60   : > { %579 = vmatprep.subr.bf16.mxu0 %v817_v0  ;;  %v583_v19 = vpack.c.bf16 %v212_v17, %v211_v16  ;;  %v213_v22 = vld [vmem:[#allocation2 + $0x30] sm:$0xff]  ;;  %v214_v23 = vld [vmem:[#allocation2 + $0x38] sm:$0xff]  ;;  %v574_v24 = vpack.c.bf16 %v225_v21, %v224_v20  ;;  %p726_p4 = scmp.ne.s32.totalorder %s1017_s6, %s725_s12  ;;  %s729_s30 = sshll.u32 %s820_s29, 4  ;;  %s730_s30 = int_to_ptr.vmem [resolvable:$false] %s729_s30 }
  0x61   : > { %v586_v25 = vpack.c.bf16 %v214_v23, %v213_v22  ;;  %v500_v26 = vld [vmem:[%s1002_s22 + $0x8] sm:$0xff]  ;;  %v206_v27 = vld [vmem:[%s1002_s22] sm:$0xff]  ;;  %s731_s23 = scalar_lea.vmem %s730_s30, 256  ;;  %p732_p12 = scmp.lt.s32.totalorder %s1017_s6, %s730_s30 }
  0x62   : > { %569 = vmatpush3.bf16.msra.mxu1 %v568_v12  ;;  %p727_p6 = pnand %p726_p4, %p935_p10  ;;  %p733_p11 = scmp.lt.s32.totalorder %s731_s23, %s725_s12 }
  0x63   : > { %581 = vmatpush3.bf16.msra.mxu0 %v580_v13  ;;  %570 = vmatprep.subr.bf16.mxu1 %v817_v0 }
  0x64   : > { %582 = vmatprep.subr.bf16.mxu0 %v817_v0  ;;  %p728_p8 = pneg %p727_p6  ;;  %p734_p0 = por %p733_p11, %p732_p12 }
  0x66   : > { %572 = vmatpush3.bf16.msra.mxu1 %v571_v18  ;;  %p735_p5 = pnand %p734_p0, %p728_p8 }
  0x67   : > { %584 = vmatpush3.bf16.msra.mxu0 %v583_v19  ;;  %573 = vmatprep.subr.bf16.mxu1 %v817_v0 }
  0x68   : > { %585 = vmatprep.subr.bf16.mxu0 %v817_v0 }
  0x6a   : > { %575 = vmatpush3.bf16.msra.mxu1 %v574_v24 }
  0x6b   : > { %587 = vmatpush3.bf16.msra.mxu0 %v586_v25 }
  0x6d   : > { %543 = vmatmul.mubr.msk.f32.vlgmr.msra.gmra.mrb[0].mxu1 %vm226_vm1, %v500_v26 }
  0x6e   : > { %562 = vmatmul.mubr.msk.f32.vlgmr.msra.gmra.mrb[0].mxu0 %vm226_vm1, %v206_v27 }
 0x140   : > { %v296_v28 = vpop.f32.mrb[0].mxu1 }
 0x141   : > { %v369_v29 = vpop.f32.mrb[0].mxu0  ;;  %v544_v30 = vpop.f32.mrb[1].mxu1 }
 0x142   : > { %v370_v31 = vadd.f32 %v369_v29, %v296_v28  ;;  %v563_v32 = vpop.f32.mrb[1].mxu0 }
 0x144   : > { %373 = vst [vmem:[%s205_s21] sm:$0xff] %v370_v31 }
 0x145   : > { %738 = shalt.err (!%p735_p5)
}
 0x146   : > { %s739_s3 = scalar_lea.hbm %s1015_s5, 128  ;;  %s743_s16 = scalar_lea.hbm %s1066_s2, 256 }
 0x147   : > { %p740_p9 = scmp.ne.s32.totalorder %s1015_s5, %s739_s3  ;;  %p744_p3 = scmp.lt.u32.totalorder %s1015_s5, %s1066_s2 }
 0x148   : > { %p745_p7 = scmp.lt.u32.totalorder %s743_s16, %s739_s3  ;;  %p747_p4 = scmp.lt.u32.totalorder %s739_s3, %s1015_s5 }
 0x149   : > { %p741_p1 = pnand %p740_p9, %p935_p10 }
 0x14a   : > { %p746_p13 = por %p745_p7, %p744_p3 }
 0x14b   : > { %p742_p2 = pneg %p741_p1 }
 0x14c   : > { %p748_p6 = por %p747_p4, %p746_p13 }
 0x14e   : > { %p749_p8 = pnand %p748_p6, %p742_p2 }
 0x150   : > { %752 = shalt.err (!%p749_p8)
}
 0x151   : > { %595 = dma.vmem_to_hbm [thread:$0]  (%p935_p10), %s1017_s6, 128, %s1015_s5, %s375_s15  }
 0x152 PF: > { %s402_s22 = sand.u32 1, %s791_s9   ;;  %p1084_p12 = scmp.ne.s32.totalorder %s1074_s20, 0 }
 0x153   : > { %p1085_p11 = scmp.ge.s32.totalorder %s811_s14, 2  ;;  %s403_s17 = scalar_lea.sflag [#allocation4], %s402_s22 }
 0x155   : > { %p606_p0 = pnand %p1085_p11, %p1084_p12 }
 0x157   : > { %786 = dma.done.wait (!%p606_p0), %s403_s17, 128  }
 0x158   : > { %788 = vsyncadd (!%p606_p0), %s403_s17, 4294967168  ;;  %s19_s14 = sadd.s32 1, %s811_s14   ;;  %s1086_s9 = smov %s795_s10 }
 0x159   : > { %p16_p5 = scmp.ge.s32.totalorder %s19_s14, 4   ;;  %s1087_s10 = smov %s799_s11 }
 0x15a   : > { %s1088_s11 = smov %s944_s28  ;;  %s1089_s12 = smov %s807_s13 }
 0x15b   : > { %s1090_s13 = smov %s1092_s25  ;;  %18 = sbr.rel (!%p16_p5) target bundleno = 7 (0x7), region = 80 }
 0x162   :  { %408 = vsyncpa [#allocation3], 1 }
 0x163   :  { %410 = vsyncpa [#allocation3 + $0x1], 1 }
 0x164   :  { %411 = vsyncpa [#allocation6], 1 }
 0x165   :  { %413 = vsyncpa [#allocation6 + $0x1], 1 }
 0x166   :  { %414 = vsyncpa [#allocation4], 1 }
 0x167   :  { %416 = vsyncpa [#allocation4 + $0x1], 1 }

</bundles_post_ra>
